<compile_context>
chip_gen: v7x
topology: tpu7x:2x2x1
jax: 0.10.0
libtpu: 0.0.40
codegen_flags: <defaults>
</compile_context>

<pallas_src>
import functools

import numpy as np
import jax
import jax.numpy as jnp
from jax.experimental import pallas as pl
from jax.experimental.pallas import tpu as pltpu


def _solar_kernel(tid_ref, c1_ref, c2_ref, L_ref, x_ref, trip_ref, sos_ref, *,
                  n_cols, nq):
    """One column (lane) tile of x.

    tid_ref : (1, T) int32   tuple id of each column (negatives); -(nq+1) otherwise
    c1_ref  : (1, T) f32     per-column  dist_pos - ||a||^2 + margin   (0 for q/p cols)
    c2_ref  : (1, T) f32     per-column  ||a||^2 - ||p||^2             (0 for q/p cols)
    L_ref   : (2*nq, dim)    fused lhs: rows [0:nq] anchors, rows [nq:2nq] (pos - anchor)
    x_ref   : (dim, T)       tile of the original input (native dtype)
    trip_ref: (1, T) f32     per-column triplet hinge terms
    sos_ref : (1, T) f32     per-column squared (d_an - d_pn) terms
    """
    t = pl.program_id(0)
    T = x_ref.shape[1]

    x = x_ref[...]                      # native dtype -> straight into the MXU
    L = L_ref[...]                      # (2*nq, dim), native dtype
    tid = tid_ref[...]                  # (1, T) int32
    c1 = c1_ref[...]                    # (1, T) f32
    c2 = c2_ref[...]                    # (1, T) f32

    # --- single MXU pass: every anchor and (pos - anchor) against every column ---
    # rows [0:nq]   : a_q . x_j
    # rows [nq:2nq] : (p_q - a_q) . x_j
    G = jnp.dot(L, x, preferred_element_type=jnp.float32)            # (2*nq, T)

    # column norms ||x_j||^2 in f32 (element-wise upcast only; no-op for f32 inputs)
    xf = x.astype(jnp.float32)
    n_norm = jnp.sum(xf * xf, axis=0, keepdims=True)                 # (1, T)

    # --- per-column row selection (compare + select, no slicing of G) ---
    col = jax.lax.broadcasted_iota(jnp.int32, (1, T), 1)
    valid = (t * T + col) < n_cols                                    # tile-overhang guard
    row = jax.lax.broadcasted_iota(jnp.int32, (2 * nq, T), 0)
    # sentinel tid = -(nq+1): neither tid nor tid+nq can match a row in [0, 2*nq)
    sel_a = jnp.sum(jnp.where(row == tid, G, 0.0), axis=0, keepdims=True)        # a . x_j
    sel_pa = jnp.sum(jnp.where(row == (tid + nq), G, 0.0), axis=0, keepdims=True)  # (p-a) . x_j

    # triplet: max(dist_pos - dist_neg + margin, 0)
    #   dist_neg = ||a||^2 + ||x||^2 - 2 a.x   ->  c1 - ||x||^2 + 2 a.x
    trip = jnp.maximum(c1 - n_norm + 2.0 * sel_a, 0.0)
    # SOS: (dist_an - dist_pn)^2 = (||a||^2 - ||p||^2 + 2 (p - a).x)^2
    sos = (c2 + 2.0 * sel_pa) ** 2

    trip_ref[...] = jnp.where(valid, trip, 0.0)
    sos_ref[...] = jnp.where(valid, sos, 0.0)


def solar_loss(x, label, margin=1.25, _lambda=10.0):
    """SOLARLoss.forward(x, label) with criterion1='triplet' (the default)."""
    label = np.asarray(label)
    x = jnp.asarray(x)
    dim, n = x.shape
    nq = int(np.sum(label == -1))
    assert nq > 0 and n % nq == 0
    S = n // nq
    assert S >= 3, "each tuple needs (q, p, >=1 negative)"

    idx_q = np.nonzero(label == -1)[0]
    idx_p = np.nonzero(label == 1)[0]
    idx_n = np.nonzero(label == 0)[0]
    assert len(idx_p) == nq and len(idx_n) == (S - 2) * nq

    # tuple id per column: the k-th negative column (original column order) belongs
    # to tuple k // (S - 2) -- exactly the pairing the reference's repeat produces.
    # Query / positive columns get sentinel -(nq+1) so that neither the anchor-row
    # compare (row == tid) nor the (p-a)-row compare (row == tid + nq) can match.
    sentinel = -(nq + 1)
    tid_np = np.full((1, n), sentinel, dtype=np.int32)
    tid_np[0, idx_n] = np.arange(len(idx_n), dtype=np.int32) // (S - 2)
    tid = jnp.asarray(tid_np)

    # compact anchors / positives (tiny: nq x dim)
    aT = x[:, idx_q].T.astype(jnp.float32)      # (nq, dim)
    pT = x[:, idx_p].T.astype(jnp.float32)      # (nq, dim)
    # fused lhs for the single MXU pass (kept in x's native dtype for bf16 inputs)
    L = jnp.concatenate([aT, pT - aT], axis=0).astype(x.dtype)   # (2*nq, dim)

    # hoisted per-tuple constants -> per-column (1, n) f32 rows (0 at q/p columns)
    a_nrm = jnp.sum(aT * aT, axis=1)                      # (nq,)
    p_nrm = jnp.sum(pT * pT, axis=1)                      # (nq,)
    d_ap = jnp.sum((aT - pT) ** 2, axis=1)                # (nq,)  dist_pos per tuple
    c1_t = d_ap - a_nrm + jnp.float32(margin)             # (nq,)
    c2_t = a_nrm - p_nrm                                  # (nq,)
    tid_flat = tid[0]
    is_neg = tid_flat >= 0
    safe_tid = jnp.maximum(tid_flat, 0)
    c1 = jnp.where(is_neg, c1_t[safe_tid], 0.0).astype(jnp.float32).reshape(1, n)
    c2 = jnp.where(is_neg, c2_t[safe_tid], 0.0).astype(jnp.float32).reshape(1, n)

    # lane-tile size: multiple of 128 (or full width when n <= 128), capped at a
    # ~4 MiB (native-dtype) slab per buffer, and clamped so grid >= 2 whenever there
    # are enough lanes (keeps both v7x TensorCores busy on the "parallel" axis).
    itemsize = x.dtype.itemsize
    if n <= 128:
        tile = n
    else:
        cap_bytes = 4 * 1024 * 1024
        cap = max(128, (cap_bytes // (dim * itemsize)) // 128 * 128)
        tile = min(cap, (n // 128) * 128)
        half = max(128, (((n + 1) // 2 + 127) // 128) * 128)   # ~ceil(n/2) rounded to 128
        if half < n:
            tile = min(tile, half)
    grid = pl.cdiv(n, tile)

    # explicit scoped-VMEM budget: 2x double-buffered x tile + small side inputs +
    # f32 norm temporaries + outputs, with headroom; safe on v5e/v6e (128 MiB phys)
    # and v7x (64 MiB phys).
    vmem_limit = int(min(48 * 1024 * 1024,
                         max(24 * 1024 * 1024, 6 * dim * tile * itemsize)))

    kernel = functools.partial(_solar_kernel, n_cols=n, nq=nq)

    trip_part, sos_part = pl.pallas_call(
        kernel,
        out_shape=(jax.ShapeDtypeStruct((1, grid * tile), jnp.float32),
                   jax.ShapeDtypeStruct((1, grid * tile), jnp.float32)),
        grid_spec=pltpu.PrefetchScalarGridSpec(
            num_scalar_prefetch=0,
            grid=(grid,),
            in_specs=[
                pl.BlockSpec((1, tile), lambda t: (0, t)),        # tuple ids
                pl.BlockSpec((1, tile), lambda t: (0, t)),        # per-column c1
                pl.BlockSpec((1, tile), lambda t: (0, t)),        # per-column c2
                pl.BlockSpec((2 * nq, dim), lambda t: (0, 0)),    # fused lhs L
                pl.BlockSpec((dim, tile), lambda t: (0, t)),      # x tile
            ],
            out_specs=[
                pl.BlockSpec((1, tile), lambda t: (0, t)),
                pl.BlockSpec((1, tile), lambda t: (0, t)),
            ],
        ),
        compiler_params=pltpu.CompilerParams(
            dimension_semantics=("parallel",),
            vmem_limit_bytes=vmem_limit),
    )(tid, c1, c2, L, x)

    trip_sum = jnp.sum(trip_part)     # sum of hinge terms
    sos_sq_sum = jnp.sum(sos_part)    # sum of (d_an - d_pn)^2
    # finalize: /nq, sqrt (only once, after the global sum), lambda-combine
    return trip_sum / nq + _lambda * jnp.sqrt(sos_sq_sum) / nq


def _solar_loss_ref(x, label, margin=1.25, _lambda=10.0):
    """Pure numpy (float64) reference mirroring the PyTorch code."""
    x = np.asarray(x, dtype=np.float64)
    label = np.asarray(label)
    nq = int(np.sum(label == -1))
    n = x.shape[1]
    S = n // nq
    xa = np.repeat(x[:, label == -1], S - 2, axis=1)
    xp = np.repeat(x[:, label == 1], S - 2, axis=1)
    xn = x[:, label == 0]
    dist_pos = np.sum((xa - xp) ** 2, axis=0)
    dist_neg = np.sum((xa - xn) ** 2, axis=0)
    dist_pn = np.sum((xp - xn) ** 2, axis=0)
    triplet = np.sum(np.clip(dist_pos - dist_neg + margin, 0, None)) / nq
    sos = np.sqrt(np.sum((dist_neg - dist_pn) ** 2)) / nq
    return triplet + _lambda * sos


if __name__ == "__main__":
    # small shapes: dim=32, nq=4 query tuples of size S=7 -> N=28 columns
    key = jax.random.PRNGKey(0)
    dim, nq, S = 32, 4, 7
    x = jax.random.normal(key, (dim, nq * S), dtype=jnp.float32)
    label = np.tile(np.array([-1, 1, 0, 0, 0, 0, 0], dtype=np.int32), nq)

    out = solar_loss(x, label, margin=1.25, _lambda=10.0)
    out = jax.block_until_ready(out)

    ref = _solar_loss_ref(np.asarray(x), label, margin=1.25, _lambda=10.0)
    # kernel uses the f32 ||a||^2 + ||x||^2 - 2 a.x expansion vs the f64 ref
    np.testing.assert_allclose(float(out), float(ref), rtol=1e-3, atol=1e-3)

    print("KERNEL_OK")
</pallas_src>

<mosaic_0001>
module attributes {stable_mosaic.version = 11 : i64} {
  func.func @_solar_kernel(%arg0: i32, %arg1: memref<1x28xi32, #tpu.memory_space<vmem>>, %arg2: memref<1x28xf32, #tpu.memory_space<vmem>>, %arg3: memref<1x28xf32, #tpu.memory_space<vmem>>, %arg4: memref<8x32xf32, #tpu.memory_space<vmem>>, %arg5: memref<32x28xf32, #tpu.memory_space<vmem>>, %arg6: memref<1x28xf32, #tpu.memory_space<vmem>>, %arg7: memref<1x28xf32, #tpu.memory_space<vmem>>) attributes {dimension_semantics = [#tpu.dimension_semantics<parallel>], iteration_bounds = array<i64: 1>, scalar_prefetch = 0 : i64, scratch_operands = 0 : i64, tpu.core_type = #tpu.core_type<tc>, window_params = [{transform_indices = @transform_0, window_bounds = array<i64: 1, 28>}, {transform_indices = @transform_1, window_bounds = array<i64: 1, 28>}, {transform_indices = @transform_2, window_bounds = array<i64: 1, 28>}, {pipeline_mode = #tpu.pipeline_mode<synchronous>, transform_indices = @transform_3, window_bounds = array<i64: 8, 32>}, {transform_indices = @transform_4, window_bounds = array<i64: 32, 28>}, {transform_indices = @transform_5, window_bounds = array<i64: 1, 28>}, {transform_indices = @transform_6, window_bounds = array<i64: 1, 28>}]} {
    %c0 = arith.constant 0 : index
    %c0_0 = arith.constant 0 : index
    %0 = vector.load %arg5[%c0, %c0_0] : memref<32x28xf32, #tpu.memory_space<vmem>>, vector<32x28xf32>
    %c0_1 = arith.constant 0 : index
    %c0_2 = arith.constant 0 : index
    %1 = vector.load %arg4[%c0_1, %c0_2] : memref<8x32xf32, #tpu.memory_space<vmem>>, vector<8x32xf32>
    %c0_3 = arith.constant 0 : index
    %c0_4 = arith.constant 0 : index
    %2 = vector.load %arg1[%c0_3, %c0_4] : memref<1x28xi32, #tpu.memory_space<vmem>>, vector<1x28xi32>
    %c0_5 = arith.constant 0 : index
    %c0_6 = arith.constant 0 : index
    %3 = vector.load %arg2[%c0_5, %c0_6] : memref<1x28xf32, #tpu.memory_space<vmem>>, vector<1x28xf32>
    %c0_7 = arith.constant 0 : index
    %c0_8 = arith.constant 0 : index
    %4 = vector.load %arg3[%c0_7, %c0_8] : memref<1x28xf32, #tpu.memory_space<vmem>>, vector<1x28xf32>
    %cst = arith.constant dense<0.000000e+00> : vector<8x28xf32>
    %5 = tpu.matmul %1, %0, %cst {dimension_numbers = #tpu.dot_dimension_numbers<[1], [0], [0], [1], [0, 0, 1, 1], [], []>} : vector<8x32xf32>, vector<32x28xf32>, vector<8x28xf32> -> vector<8x28xf32>
    %6 = arith.mulf %0, %0 : vector<32x28xf32>
    %cst_9 = arith.constant dense<0.000000e+00> : vector<28xf32>
    %7 = vector.multi_reduction <add>, %6, %cst_9 [0] : vector<32x28xf32> to vector<28xf32>
    %8 = vector.shape_cast %7 : vector<28xf32> to vector<1x28xf32>
    %9 = tpu.iota {dimensions = array<i32: 1>} : vector<1x28xi32>
    %c28_i32 = arith.constant 28 : i32
    %10 = arith.muli %arg0, %c28_i32 : i32
    %11 = vector.broadcast %10 : i32 to vector<1x28xi32>
    %12 = arith.addi %11, %9 : vector<1x28xi32>
    %c28_i32_10 = arith.constant 28 : i32
    %13 = vector.broadcast %c28_i32_10 : i32 to vector<1x28xi32>
    %14 = arith.cmpi slt, %12, %13 : vector<1x28xi32>
    %15 = tpu.iota {dimensions = array<i32: 0>} : vector<8x28xi32>
    %16 = vector.broadcast %2 : vector<1x28xi32> to vector<8x28xi32>
    %17 = arith.cmpi eq, %15, %16 : vector<8x28xi32>
    %cst_11 = arith.constant 0.000000e+00 : f32
    %18 = vector.broadcast %cst_11 : f32 to vector<8x28xf32>
    %19 = arith.select %17, %5, %18 : vector<8x28xi1>, vector<8x28xf32>
    %cst_12 = arith.constant dense<0.000000e+00> : vector<28xf32>
    %20 = vector.multi_reduction <add>, %19, %cst_12 [0] : vector<8x28xf32> to vector<28xf32>
    %21 = vector.shape_cast %20 : vector<28xf32> to vector<1x28xf32>
    %c4_i32 = arith.constant 4 : i32
    %22 = vector.broadcast %c4_i32 : i32 to vector<1x28xi32>
    %23 = arith.addi %2, %22 : vector<1x28xi32>
    %24 = vector.broadcast %23 : vector<1x28xi32> to vector<8x28xi32>
    %25 = arith.cmpi eq, %15, %24 : vector<8x28xi32>
    %cst_13 = arith.constant 0.000000e+00 : f32
    %26 = vector.broadcast %cst_13 : f32 to vector<8x28xf32>
    %27 = arith.select %25, %5, %26 : vector<8x28xi1>, vector<8x28xf32>
    %cst_14 = arith.constant dense<0.000000e+00> : vector<28xf32>
    %28 = vector.multi_reduction <add>, %27, %cst_14 [0] : vector<8x28xf32> to vector<28xf32>
    %29 = vector.shape_cast %28 : vector<28xf32> to vector<1x28xf32>
    %30 = arith.subf %3, %8 : vector<1x28xf32>
    %cst_15 = arith.constant 2.000000e+00 : f32
    %31 = vector.broadcast %cst_15 : f32 to vector<1x28xf32>
    %32 = arith.mulf %31, %21 : vector<1x28xf32>
    %33 = arith.addf %30, %32 : vector<1x28xf32>
    %cst_16 = arith.constant 0.000000e+00 : f32
    %34 = vector.broadcast %cst_16 : f32 to vector<1x28xf32>
    %35 = arith.maximumf %33, %34 : vector<1x28xf32>
    %cst_17 = arith.constant 2.000000e+00 : f32
    %36 = vector.broadcast %cst_17 : f32 to vector<1x28xf32>
    %37 = arith.mulf %36, %29 : vector<1x28xf32>
    %38 = arith.addf %4, %37 : vector<1x28xf32>
    %39 = arith.mulf %38, %38 : vector<1x28xf32>
    %cst_18 = arith.constant 0.000000e+00 : f32
    %40 = vector.broadcast %cst_18 : f32 to vector<1x28xf32>
    %41 = arith.select %14, %35, %40 : vector<1x28xi1>, vector<1x28xf32>
    %c0_19 = arith.constant 0 : index
    %c0_20 = arith.constant 0 : index
    %42 = vector.load %arg6[%c0_19, %c0_20] : memref<1x28xf32, #tpu.memory_space<vmem>>, vector<1x28xf32>
    tpu.vector_store %arg6[%c0_19, %c0_20], %41 {strides = array<i32>} : memref<1x28xf32, #tpu.memory_space<vmem>>, vector<1x28xf32>,
    %cst_21 = arith.constant 0.000000e+00 : f32
    %43 = vector.broadcast %cst_21 : f32 to vector<1x28xf32>
    %44 = arith.select %14, %39, %43 : vector<1x28xi1>, vector<1x28xf32>
    %c0_22 = arith.constant 0 : index
    %c0_23 = arith.constant 0 : index
    %45 = vector.load %arg7[%c0_22, %c0_23] : memref<1x28xf32, #tpu.memory_space<vmem>>, vector<1x28xf32>
    tpu.vector_store %arg7[%c0_22, %c0_23], %44 {strides = array<i32>} : memref<1x28xf32, #tpu.memory_space<vmem>>, vector<1x28xf32>,
    return
  }
  func.func @transform_0(%arg0: i32) -> (i32, i32) {
    %c0_i32 = arith.constant 0 : i32
    %c0_i32_0 = arith.constant 0 : i32
    return %c0_i32, %arg0 : i32, i32
  }
  func.func @transform_1(%arg0: i32) -> (i32, i32) {
    %c0_i32 = arith.constant 0 : i32
    %c0_i32_0 = arith.constant 0 : i32
    return %c0_i32, %arg0 : i32, i32
  }
  func.func @transform_2(%arg0: i32) -> (i32, i32) {
    %c0_i32 = arith.constant 0 : i32
    %c0_i32_0 = arith.constant 0 : i32
    return %c0_i32, %arg0 : i32, i32
  }
  func.func @transform_3(%arg0: i32) -> (i32, i32) {
    %c0_i32 = arith.constant 0 : i32
    %c0_i32_0 = arith.constant 0 : i32
    %c0_i32_1 = arith.constant 0 : i32
    return %c0_i32, %c0_i32_0 : i32, i32
  }
  func.func @transform_4(%arg0: i32) -> (i32, i32) {
    %c0_i32 = arith.constant 0 : i32
    %c0_i32_0 = arith.constant 0 : i32
    return %c0_i32, %arg0 : i32, i32
  }
  func.func @transform_5(%arg0: i32) -> (i32, i32) {
    %c0_i32 = arith.constant 0 : i32
    %c0_i32_0 = arith.constant 0 : i32
    return %c0_i32, %arg0 : i32, i32
  }
  func.func @transform_6(%arg0: i32) -> (i32, i32) {
    %c0_i32 = arith.constant 0 : i32
    %c0_i32_0 = arith.constant 0 : i32
    return %c0_i32, %arg0 : i32, i32
  }
}

</mosaic_0001>

<bundles_post_ra>
// kernel: tpu_custom_call.1
= control target key start
LH: loop header
LB: loop body
LE: loop exit
PB: predicated region body
PF: predicated region fallthrough
CT: control target
= control target key end

     0   :  { %12 = vsyncpa [#allocation3], 0  ;;  %s477_s0 = inlined_call_operand.hbm [shape: s32[1,28], index: 0, kind: input, shape index: {}]   ;;  %s478_s1 = inlined_call_operand.vmem [shape: f32[1,28], index: 1, kind: input, shape index: {}]   ;;  %s479_s2 = inlined_call_operand.vmem [shape: f32[1,28], index: 2, kind: input, shape index: {}]   ;;  %s480_s3 = inlined_call_operand.vmem [shape: f32[8,32], index: 3, kind: input, shape index: {}]   ;;  %s481_s4 = inlined_call_operand.hbm [shape: f32[32,28], index: 4, kind: input, shape index: {}]   ;;  %s482_s5 = inlined_call_operand.hbm [shape: f32[1,28], index: 5, kind: output, shape index: {0}]   ;;  %s483_s6 = inlined_call_operand.hbm [shape: f32[1,28], index: 6, kind: output, shape index: {1}]  }
   0x1   :  { %13 = vsyncpa [#allocation6], 0 }
   0x2   :  { %14 = vsyncpa [#allocation4], 0 }
   0x3   :  { %15 = vsyncpa [#allocation9], 0  ;;  %s355_s21 = smov [#allocation2]   ;;  %s356_s23 = smov [#allocation5]  }
   0x4   :  { %s22_s22 = sshll.u32 %s355_s21, 4  ;;  %s37_s24 = sshll.u32 %s356_s23, 4  ;;  %s23_s22 = int_to_ptr.vmem [resolvable:$true] %s22_s22  ;;  %s399_s24 = int_to_ptr.vmem [resolvable:$true] %s37_s24 }
   0x5   :  { %s259_s27 = scalar_lea.hbm %s477_s0, 16 }
   0x6   :  { %p260_p0 = scmp.ne.s32.totalorder %s477_s0, %s259_s27  ;;  %p263_p1 = scmp.lt.u32.totalorder %s259_s27, %s477_s0 }
   0x8   :  { %p265_p2 = pnand %p263_p1, %p260_p0 }
   0xa   :  { %268 = shalt.err (!%p265_p2)
}
   0xb   :  { %s269_s8 = scalar_lea.vmem %s23_s22, 16  ;;  %s273_s9 = scalar_lea.vmem %s23_s22, 32 }
   0xc   :  { %p270_p3 = scmp.ne.s32.totalorder %s23_s22, %s269_s8  ;;  %p274_p4 = scmp.lt.s32.totalorder %s23_s22, %s23_s22 }
   0xd   :  { %p275_p5 = scmp.lt.s32.totalorder %s273_s9, %s269_s8 }
   0xf   :  { %p276_p6 = por %p275_p5, %p274_p4 }
  0x11   :  { %p277_p7 = pnand %p276_p6, %p270_p3 }
  0x13   :  { %280 = shalt.err (!%p277_p7)
}
  0x14   :  { %25 = dma.hbm_to_vmem [thread:$0]  %s477_s0, 16, %s23_s22, [#allocation3]  }
  0x15   :  { %s281_s14 = scalar_lea.hbm %s481_s4, 512 }
  0x16   :  { %p282_p8 = scmp.ne.s32.totalorder %s481_s4, %s281_s14  ;;  %p285_p9 = scmp.lt.u32.totalorder %s281_s14, %s481_s4 }
  0x18   :  { %p287_p10 = pnand %p285_p9, %p282_p8 }
  0x1a   :  { %290 = shalt.err (!%p287_p10)
}
  0x1b   :  { %s291_s19 = scalar_lea.vmem %s399_s24, 512  ;;  %p296_p12 = scmp.lt.s32.totalorder %s399_s24, %s399_s24 }
  0x1c   :  { %p292_p11 = scmp.ne.s32.totalorder %s399_s24, %s291_s19  ;;  %p297_p13 = scmp.lt.s32.totalorder %s291_s19, %s291_s19 }
  0x1e   :  { %p298_p0 = por %p297_p13, %p296_p12 }
  0x20   :  { %p299_p1 = pnand %p298_p0, %p292_p11 }
  0x22   :  { %302 = shalt.err (!%p299_p1)
}
  0x23   :  { %s357_s0 = smov 128   ;;  %s358_s20 = smov 8  }
  0x24   :  { %43 = dma.hbm_to_vmem [thread:$0]  %s481_s4, 512, %s399_s24, [#allocation6], %s357_s0, %s357_s0, %s358_s20  }
  0x25   :  { %347 = dma.done.wait [#allocation3], 16  }
  0x26   :  { %348 = vsyncadd [#allocation3], 4294967280 }
  0x27   :  { %349 = dma.done.wait [#allocation6], 512  }
  0x28   :  { %350 = vsyncadd [#allocation6], 4294966784  ;;  %v359_v0 = vmov 0.0|0.0   ;;  %vm360_vm0 = vmmov 0   ;;  %v361_v1 = vmov 0.0   ;;  %v50_v2 = vld [vmem:[#allocation5] sm:$0xff]  ;;  %v150_v20 = vlaneseq }
  0x29   :  { %244 = vmatprep.subr.bf16.mxu0 %v359_v0  ;;  %241 = vmatprep.mubr.msk.f32.mxu0 %vm360_vm0, %v361_v1  ;;  %v51_v3 = vld [vmem:[#allocation5 + $0x8] sm:$0xff]  ;;  %vm136_vm1 = vcmask 228352   ;;  %v52_v4 = vld [vmem:[#allocation5 + $0x10] sm:$0xff]  ;;  %v132_v6 = vmul.f32 %v50_v2, %v50_v2  ;;  %v53_v8 = vld [vmem:[#allocation5 + $0x18] sm:$0xff]  ;;  %vm58_vm2 = vcmask 261120   ;;  %s362_s27 = smov [#allocation7]  }
  0x2a   :  { %v245_v5 = vpack.c.bf16 %v51_v3, %v50_v2  ;;  %v133_v7 = vmul.f32 %v51_v3, %v51_v3  ;;  %v134_v9 = vmul.f32 %v52_v4, %v52_v4  ;;  %v135_v10 = vmul.f32 %v53_v8, %v53_v8  ;;  %v54_v18 = vld [vmem:[%s480_s3] sm:$0xff]  ;;  %v55_v22 = vld [vmem:[#allocation2] sm:$0x1]  ;;  %s203_s28 = sshll.u32 %s362_s27, 4  ;;  %s363_s29 = smov [#allocation8]   ;;  %s204_s28 = int_to_ptr.vmem [resolvable:$true] %s203_s28 }
  0x2b   :  { %v137_v11 = vsel %vm136_vm1, %v132_v6, 0.0  ;;  %v248_v13 = vpack.c.bf16 %v53_v8, %v52_v4  ;;  %v157_v21 = vshrl.u32 %v150_v20, 7  ;;  %v171_v25 = vadd.s32 4, %v55_v22  ;;  %v56_v47 = vld [vmem:[%s478_s1] sm:$0x1]  ;;  %s213_s30 = sshll.u32 %s363_s29, 4  ;;  %p308_p3 = scmp.lt.s32.totalorder %s204_s28, %s204_s28  ;;  %s445_s30 = int_to_ptr.vmem [resolvable:$true] %s213_s30 }
  0x2c   :  { %246 = vmatpush3.bf16.msra.mxu0 %v245_v5  ;;  %v138_v12 = vsel %vm136_vm1, %v133_v7, 0.0  ;;  %v140_v14 = vsel %vm136_vm1, %v134_v9, 0.0  ;;  %v142_v16 = vsel %vm136_vm1, %v135_v10, 0.0  ;;  %v151_v53 = vand.u32 127, %v150_v20  ;;  %v57_v54 = vld [vmem:[%s479_s2] sm:$0x1] }
  0x2d   :  { %v139_v15 = vadd.f32 %v138_v12, %v137_v11  ;;  %247 = vmatprep.subr.bf16.mxu0 %v359_v0  ;;  %v160_v24 = vsub.s32 0, %v157_v21  ;;  %vm193_vm6 = vcmask 221184   ;;  %s303_s1 = scalar_lea.vmem %s204_s28, 16  ;;  %s307_s2 = scalar_lea.vmem %s204_s28, 32 }
  0x2e   :  { %vm155_vm5 = vcmp.lt.s32.totalorder %v151_v53, 28  ;;  %p304_p2 = scmp.ne.s32.totalorder %s204_s28, %s303_s1  ;;  %p309_p4 = scmp.lt.s32.totalorder %s307_s2, %s303_s1 }
  0x2f   :  { %v141_v17 = vadd.f32 %v140_v14, %v139_v15  ;;  %v161_v27 = vrot.slane %v55_v22, %v160_v24  ;;  %v175_v28 = vrot.slane %v171_v25, %v160_v24 }
  0x30   :  { %249 = vmatpush3.bf16.msra.mxu0 %v248_v13  ;;  %p310_p5 = por %p309_p4, %p308_p3 }
  0x31   :  { %v143_v19 = vadd.f32 %v142_v16, %v141_v17  ;;  %vm162_vm3 = vcmp.eq.s32.totalorder %v157_v21, %v161_v27  ;;  %vm176_vm4 = vcmp.eq.s32.totalorder %v157_v21, %v175_v28 }
  0x32   :  { %p311_p6 = pnand %p310_p5, %p304_p2 }
  0x33   :  { %242 = vmatmul.mubr.msk.f32.vlgmr.msra.gmra.mrb[0].mxu0 %vm58_vm2, %v54_v18  ;;  %v144_v23 = vrot.slane %v143_v19, 4 }
  0x35   :  { %v145_v26 = vadd.f32 %v144_v23, %v143_v19 }
  0x37   :  { %v146_v29 = vrot.slane %v145_v26, 2 }
  0x39   :  { %v147_v34 = vadd.f32 %v146_v29, %v145_v26 }
  0x3b   :  { %v148_v41 = vrot.slane %v147_v34, 1 }
  0x3d   :  { %v149_v46 = vadd.f32 %v148_v41, %v147_v34 }
  0x3f   :  { %v185_v52 = vsub.f32 %v56_v47, %v149_v46 }
 0x106   :  { %v128_v30 = vpop.f32.mrb[0].mxu0 }
 0x107   :  { %v163_v31 = vsel %vm162_vm3, %v128_v30, 0.0  ;;  %v177_v32 = vsel %vm176_vm4, %v128_v30, 0.0  ;;  %v243_v33 = vpop.f32.mrb[1].mxu0 }
 0x108   :  { %v164_v35 = vsel %vm136_vm1, %v163_v31, 0.0  ;;  %v178_v36 = vsel %vm136_vm1, %v177_v32, 0.0 }
 0x109   :  { %v165_v37 = vrot.slane %v164_v35, 4  ;;  %v179_v38 = vrot.slane %v178_v36, 4 }
 0x10b   :  { %v166_v39 = vadd.f32 %v165_v37, %v164_v35  ;;  %v180_v40 = vadd.f32 %v179_v38, %v178_v36 }
 0x10d   :  { %v167_v42 = vrot.slane %v166_v39, 2  ;;  %v181_v43 = vrot.slane %v180_v40, 2 }
 0x10f   :  { %v168_v44 = vadd.f32 %v167_v42, %v166_v39  ;;  %v182_v45 = vadd.f32 %v181_v43, %v180_v40 }
 0x111   :  { %v169_v48 = vrot.slane %v168_v44, 1  ;;  %v183_v49 = vrot.slane %v182_v45, 1 }
 0x113   :  { %v170_v50 = vadd.f32 %v169_v48, %v168_v44  ;;  %v184_v51 = vadd.f32 %v183_v49, %v182_v45 }
 0x115   :  { %v186_v55 = vmul.f32 2.0, %v170_v50  ;;  %v189_v56 = vmul.f32 2.0, %v184_v51 }
 0x117   :  { %v187_v57 = vadd.f32 %v186_v55, %v185_v52  ;;  %v190_v58 = vadd.f32 %v189_v56, %v57_v54 }
 0x119   :  { %v188_v59 = vmax.f32 %v187_v57, 0.0  ;;  %v191_v60 = vmul.f32 %v190_v58, %v190_v58 }
 0x11b   :  { %v192_v61 = vsel %vm155_vm5, %v188_v59, 0.0  ;;  %v195_v62 = vsel %vm155_vm5, %v191_v60, 0.0 }
 0x11c   :  { %194 = vst.msk [vmem:[#allocation7] sm:$0x1] %vm193_vm6, %v192_v61  ;;  %196 = vst.msk [vmem:[#allocation8] sm:$0x1] %vm193_vm6, %v195_v62 }
 0x11d   :  { %314 = shalt.err (!%p311_p6)
}
 0x11e   :  { %s315_s9 = scalar_lea.hbm %s482_s5, 16 }
 0x11f   :  { %p316_p7 = scmp.ne.s32.totalorder %s482_s5, %s315_s9  ;;  %p319_p8 = scmp.lt.u32.totalorder %s315_s9, %s482_s5 }
 0x121   :  { %p321_p9 = pnand %p319_p8, %p316_p7 }
 0x123   :  { %324 = shalt.err (!%p321_p9)
}
 0x124   :  { %206 = dma.vmem_to_hbm [thread:$0]  %s204_s28, 16, %s482_s5, [#allocation4]  }
 0x125   :  { %s325_s16 = scalar_lea.vmem %s445_s30, 16  ;;  %s329_s17 = scalar_lea.vmem %s445_s30, 32 }
 0x126   :  { %p326_p10 = scmp.ne.s32.totalorder %s445_s30, %s325_s16  ;;  %p330_p11 = scmp.lt.s32.totalorder %s445_s30, %s445_s30 }
 0x127   :  { %p331_p12 = scmp.lt.s32.totalorder %s329_s17, %s325_s16 }
 0x129   :  { %p332_p13 = por %p331_p12, %p330_p11 }
 0x12b   :  { %p333_p0 = pnand %p332_p13, %p326_p10 }
 0x12d   :  { %336 = shalt.err (!%p333_p0)
}
 0x12e   :  { %s337_s0 = scalar_lea.hbm %s483_s6, 16 }
 0x12f   :  { %p338_p1 = scmp.ne.s32.totalorder %s483_s6, %s337_s0  ;;  %p341_p2 = scmp.lt.u32.totalorder %s337_s0, %s483_s6 }
 0x131   :  { %p343_p3 = pnand %p341_p2, %p338_p1 }
 0x133   :  { %346 = shalt.err (!%p343_p3)
}
 0x134   :  { %216 = dma.vmem_to_hbm [thread:$0]  %s445_s30, 16, %s483_s6, [#allocation9]  }
 0x135   :  { %351 = dma.done.wait [#allocation4], 16  }
 0x136   :  { %352 = vsyncadd [#allocation4], 4294967280 }
 0x137   :  { %353 = dma.done.wait [#allocation9], 16  }
 0x138   :  { %354 = vsyncadd [#allocation9], 4294967280 }
 0x139   :  { %223 = vsyncpa [#allocation3], 1 }
 0x13a   :  { %224 = vsyncpa [#allocation6], 1 }
 0x13b   :  { %225 = vsyncpa [#allocation4], 1 }
 0x13c   :  { %226 = vsyncpa [#allocation9], 1 }

</bundles_post_ra>
